<compile_context>
chip_gen: v7x
topology: tpu7x:2x2x1
jax: 0.10.0
libtpu: 0.0.40
codegen_flags: <defaults>
</compile_context>

<pallas_src>
import jax
import jax.numpy as jnp
from jax.experimental import pallas as pl
from jax.experimental.pallas import tpu as pltpu

EPS = 1e-5  # nn.BatchNorm2d default eps
_MiB = 1 << 20


# --------------------------------------------------------------------------
# Resident-slab fast path: whole (N, tc, HW) block in VMEM, 1R + 1W of HBM.
# --------------------------------------------------------------------------
def _bn_relu_resident_kernel(x_ref, gamma_ref, beta_ref, o_ref):
    # x_ref / o_ref: (N, tc, HW)      gamma_ref / beta_ref: (tc, 1)  (f32)
    x = x_ref[...].astype(jnp.float32)
    n, _, hw = x.shape
    inv_count = 1.0 / (n * hw)

    # Fused stats: lane (XLU) reduce per N-slice, then fold the batch axis.
    # Partials are only (N, tc, 1) -- no (tc, HW) f32 temporaries.
    s_parts = jnp.sum(x, axis=2, keepdims=True)                    # (N, tc, 1)
    mean = jnp.sum(s_parts, axis=0, keepdims=True) * inv_count     # (1, tc, 1)

    # Two-pass (centered) variance: the block is resident in VMEM, so the
    # second sweep is hidden under the HBM-bound DMA and avoids the
    # E[x^2] - mean^2 cancellation error. PyTorch normalizes with the biased
    # variance in training mode.
    xc = x - mean
    v_parts = jnp.sum(xc * xc, axis=2, keepdims=True)              # (N, tc, 1)
    var = jnp.sum(v_parts, axis=0, keepdims=True) * inv_count      # (1, tc, 1)
    inv_std = jax.lax.rsqrt(var + EPS)

    # Fold the affine into one per-channel FMA, then ReLU.
    scale = inv_std * gamma_ref[...][None, :, :]                   # (1, tc, 1)
    shift = beta_ref[...][None, :, :]                              # (1, tc, 1)
    o_ref[...] = jnp.maximum(xc * scale + shift, 0.0).astype(o_ref.dtype)


# --------------------------------------------------------------------------
# Tiling / VMEM-budget helpers.
# --------------------------------------------------------------------------
def _vmem_capacity_bytes():
    try:
        return int(pltpu.get_tpu_info().vmem_capacity_bytes)
    except Exception:
        return 64 * _MiB  # conservative default (v7x per-TensorCore VMEM)


def _sublane(itemsize):
    # f32 -> 8, bf16 -> 16, int8/fp8 -> 32 (sublane packing of narrow dtypes).
    return max(8, 32 // max(1, itemsize))


def _per_elem_bytes(itemsize):
    # in + out, double-buffered, plus ~2 f32-sized compiler temporaries
    # (widened x and centered xc).
    return 4 * itemsize + 8


def _vmem_limit(block_bytes, cap):
    return int(min(int(0.9 * cap), max(32 * _MiB, block_bytes + 4 * _MiB)))


def _pick_tile_c(c, n, hw, itemsize, budget_bytes, sublane):
    """Channel tile for the resident path, or None if nothing fits the budget.

    Preference order: >=4 pipeline steps (DMA overlap), >=2 steps, an even step
    count (v7x megacore split), then the largest such tile.
    """
    per_chan = n * hw * _per_elem_bytes(itemsize)
    cands = sorted({t for t in range(sublane, c, sublane) if c % t == 0} | {c})
    fitting = [t for t in cands if t * per_chan <= budget_bytes]
    if not fitting:
        return None

    def rank(t):
        g = c // t
        return (g >= 4, g >= 2, (g % 2 == 0) or (g == 1), t)

    return max(fitting, key=rank)


def _pick_tiles_fallback(c, hw, itemsize, budget_bytes, sublane):
    """Channel / HW tiles for the tiled-reduction fallback path."""
    tc = sublane if (c % sublane == 0) else c
    per_elem = tc * _per_elem_bytes(itemsize)
    if hw * per_elem <= budget_bytes:
        return tc, hw
    th = None
    t = 128
    while t < hw:
        if hw % t == 0 and t * per_elem <= budget_bytes:
            th = t
        t += 128
    if th is None:
        # TODO(synk): HW has no 128-multiple divisor that fits the budget;
        # fall back to full HW extent and let vmem_limit_bytes decide.
        th = hw
    return tc, th


# --------------------------------------------------------------------------
# Tiled-reduction fallback: stats pass (accumulators + pl.when init/finalize)
# followed by an elementwise apply pass. 2R + 1W of HBM, but never requires
# the whole (N, tc, HW) slab resident -- keeps v7x (64 MiB/TC) usable at
# ResNet / large-batch scale.
# --------------------------------------------------------------------------
def _bn_relu_tiled(x3, g2, b2, budget, cap, itemsize, sublane):
    n, c, hw = x3.shape
    tc, th = _pick_tiles_fallback(c, hw, itemsize, budget, sublane)
    inv_count = 1.0 / (n * hw)
    block_bytes = tc * th * _per_elem_bytes(itemsize)
    vmem_limit = _vmem_limit(block_bytes, cap)

    def stats_kernel(x_ref, g_ref, be_ref, scale_ref, bias_ref, s_acc, ss_acc):
        b = pl.program_id(1)
        j = pl.program_id(2)

        @pl.when(jnp.logical_and(b == 0, j == 0))
        def _():
            s_acc[...] = jnp.zeros_like(s_acc)
            ss_acc[...] = jnp.zeros_like(ss_acc)

        x = x_ref[0].astype(jnp.float32)                     # (tc, th)
        s_acc[...] += jnp.sum(x, axis=1, keepdims=True)      # (tc, 1)
        ss_acc[...] += jnp.sum(x * x, axis=1, keepdims=True)

        @pl.when(jnp.logical_and(b == pl.num_programs(1) - 1,
                                 j == pl.num_programs(2) - 1))
        def _():
            mean = s_acc[...] * inv_count
            # Single-sweep E[x^2]-mean^2 here (the block is not resident);
            # guard against the small negatives cancellation can produce.
            var = jnp.maximum(ss_acc[...] * inv_count - mean * mean, 0.0)
            sc = jax.lax.rsqrt(var + EPS) * g_ref[...]
            scale_ref[...] = sc
            bias_ref[...] = be_ref[...] - mean * sc

    scale, bias = pl.pallas_call(
        stats_kernel,
        out_shape=(jax.ShapeDtypeStruct((c, 1), jnp.float32),
                   jax.ShapeDtypeStruct((c, 1), jnp.float32)),
        grid_spec=pltpu.PrefetchScalarGridSpec(
            num_scalar_prefetch=0,
            grid=(c // tc, n, hw // th),
            in_specs=[
                pl.BlockSpec((1, tc, th), lambda i, b, j: (b, i, j)),
                pl.BlockSpec((tc, 1), lambda i, b, j: (i, 0)),
                pl.BlockSpec((tc, 1), lambda i, b, j: (i, 0)),
            ],
            out_specs=(pl.BlockSpec((tc, 1), lambda i, b, j: (i, 0)),
                       pl.BlockSpec((tc, 1), lambda i, b, j: (i, 0))),
            scratch_shapes=[pltpu.VMEM((tc, 1), jnp.float32),
                            pltpu.VMEM((tc, 1), jnp.float32)],
        ),
        compiler_params=pltpu.CompilerParams(
            dimension_semantics=("parallel", "arbitrary", "arbitrary"),
            vmem_limit_bytes=vmem_limit,
        ),
    )(x3, g2, b2)

    def apply_kernel(x_ref, scale_ref, bias_ref, o_ref):
        x = x_ref[0].astype(jnp.float32)                      # (tc, th)
        y = jnp.maximum(x * scale_ref[...] + bias_ref[...], 0.0)
        o_ref[...] = y[None, :, :].astype(o_ref.dtype)

    return pl.pallas_call(
        apply_kernel,
        out_shape=jax.ShapeDtypeStruct((n, c, hw), x3.dtype),
        grid_spec=pltpu.PrefetchScalarGridSpec(
            num_scalar_prefetch=0,
            grid=(c // tc, n, hw // th),
            in_specs=[
                pl.BlockSpec((1, tc, th), lambda i, b, j: (b, i, j)),
                pl.BlockSpec((tc, 1), lambda i, b, j: (i, 0)),
                pl.BlockSpec((tc, 1), lambda i, b, j: (i, 0)),
            ],
            out_specs=pl.BlockSpec((1, tc, th), lambda i, b, j: (b, i, j)),
        ),
        compiler_params=pltpu.CompilerParams(
            dimension_semantics=("parallel", "parallel", "parallel"),
            vmem_limit_bytes=vmem_limit,
        ),
    )(x3, scale, bias)


def _bn_relu_resident(x3, g2, b2, tc, cap):
    n, c, hw = x3.shape
    itemsize = x3.dtype.itemsize
    block_bytes = tc * n * hw * _per_elem_bytes(itemsize)
    vmem_limit = _vmem_limit(block_bytes, cap)
    return pl.pallas_call(
        _bn_relu_resident_kernel,
        out_shape=jax.ShapeDtypeStruct((n, c, hw), x3.dtype),
        grid_spec=pltpu.PrefetchScalarGridSpec(
            num_scalar_prefetch=0,
            grid=(c // tc,),
            in_specs=[
                pl.BlockSpec((n, tc, hw), lambda i: (0, i, 0)),
                pl.BlockSpec((tc, 1), lambda i: (i, 0)),
                pl.BlockSpec((tc, 1), lambda i: (i, 0)),
            ],
            out_specs=pl.BlockSpec((n, tc, hw), lambda i: (0, i, 0)),
        ),
        compiler_params=pltpu.CompilerParams(
            dimension_semantics=("parallel",),
            vmem_limit_bytes=vmem_limit,
        ),
    )(x3, g2, b2)


# --------------------------------------------------------------------------
# Public wrapper: training-mode BatchNorm2d (batch statistics) + ReLU.
# --------------------------------------------------------------------------
def batchnorm_relu(x_nchw, gamma, beta, *, force_tiled=False):
    """x_nchw: (N, C, H, W) float32/bfloat16; gamma, beta: (C,).

    Returns max((x - mean_c) / sqrt(var_c + eps) * gamma_c + beta_c, 0) with
    per-channel batch statistics, in the input dtype.
    """
    n, c, h, w = x_nchw.shape
    hw = h * w
    itemsize = x_nchw.dtype.itemsize
    sub = _sublane(itemsize)

    # TODO(synk): PyTorch training-mode BN also updates running_mean /
    # running_var (with unbiased variance); those buffer side-effects are out
    # of scope here -- only the normalized forward output is produced.
    # TODO(synk): when H*W is not a 128 multiple (7x7/14x14/... maps) the
    # lane-padded last dim produces masked stores; results stay correct.

    x3 = x_nchw.reshape(n, c, hw)            # free: contiguous NCHW reshape
    g2 = gamma.reshape(c, 1).astype(jnp.float32)
    b2 = beta.reshape(c, 1).astype(jnp.float32)

    cap = _vmem_capacity_bytes()
    budget = int(0.75 * cap)                 # per-generation VMEM budget

    tc = None if force_tiled else _pick_tile_c(c, n, hw, itemsize, budget, sub)
    if tc is not None:
        y3 = _bn_relu_resident(x3, g2, b2, tc, cap)
    else:
        y3 = _bn_relu_tiled(x3, g2, b2, budget, cap, itemsize, sub)
    return y3.reshape(n, c, h, w)


def _reference(x_nchw, gamma, beta):
    x = x_nchw.astype(jnp.float32)
    mean = jnp.mean(x, axis=(0, 2, 3), keepdims=True)
    var = jnp.mean((x - mean) ** 2, axis=(0, 2, 3), keepdims=True)
    y = (x - mean) * jax.lax.rsqrt(var + EPS)
    y = y * gamma.reshape(1, -1, 1, 1) + beta.reshape(1, -1, 1, 1)
    return jnp.maximum(y, 0.0)


if __name__ == "__main__":
    key = jax.random.PRNGKey(0)
    N, C, H, W = 2, 4, 16, 16
    x = jax.random.normal(key, (N, C, H, W), dtype=jnp.float32)

    # BatchNorm2d affine params (PyTorch default weight=1, bias=0 -- perturbed
    # deterministically to exercise the affine path).
    gamma = 1.0 + 0.1 * jnp.arange(C, dtype=jnp.float32)
    beta = 0.01 * jnp.arange(C, dtype=jnp.float32)

    ref = _reference(x, gamma, beta)

    # 1) Resident-slab fast path (1R + 1W of HBM, channel-tiled pipeline).
    out = jax.block_until_ready(batchnorm_relu(x, gamma, beta))
    assert out.shape == (N, C, H, W)
    assert jnp.max(jnp.abs(out - ref)) < 1e-4

    # 2) Tiled-reduction fallback (the path large N*H*W takes on v7x 64 MiB VMEM).
    out_t = jax.block_until_ready(batchnorm_relu(x, gamma, beta, force_tiled=True))
    assert jnp.max(jnp.abs(out_t - ref)) < 2e-4

    # 3) bf16 I/O path (halves HBM bytes; stats and affine remain f32 in-kernel).
    x_bf16 = x.astype(jnp.bfloat16)
    ref_bf16 = _reference(x_bf16, gamma, beta)
    out_b = jax.block_until_ready(batchnorm_relu(x_bf16, gamma, beta))
    assert out_b.dtype == jnp.bfloat16
    assert jnp.max(jnp.abs(out_b.astype(jnp.float32) - ref_bf16)) < 5e-2

    print("KERNEL_OK")
</pallas_src>

<mosaic_0001>
module attributes {stable_mosaic.version = 11 : i64} {
  func.func @_bn_relu_resident_kernel(%arg0: i32, %arg1: memref<2x4x256xf32, #tpu.memory_space<vmem>>, %arg2: memref<4x1xf32, #tpu.memory_space<vmem>>, %arg3: memref<4x1xf32, #tpu.memory_space<vmem>>, %arg4: memref<2x4x256xf32, #tpu.memory_space<vmem>>) attributes {dimension_semantics = [#tpu.dimension_semantics<parallel>], iteration_bounds = array<i64: 1>, scalar_prefetch = 0 : i64, scratch_operands = 0 : i64, tpu.core_type = #tpu.core_type<tc>, window_params = [{transform_indices = @transform_0, window_bounds = array<i64: 2, 4, 256>}, {transform_indices = @transform_1, window_bounds = array<i64: 4, 1>}, {transform_indices = @transform_2, window_bounds = array<i64: 4, 1>}, {transform_indices = @transform_3, window_bounds = array<i64: 2, 4, 256>}]} {
    %c0 = arith.constant 0 : index
    %c0_0 = arith.constant 0 : index
    %c0_1 = arith.constant 0 : index
    %0 = vector.load %arg1[%c0, %c0_0, %c0_1] : memref<2x4x256xf32, #tpu.memory_space<vmem>>, vector<2x4x256xf32>
    %cst = arith.constant dense<0.000000e+00> : vector<2x4xf32>
    %1 = vector.multi_reduction <add>, %0, %cst [2] : vector<2x4x256xf32> to vector<2x4xf32>
    %2 = vector.shape_cast %1 : vector<2x4xf32> to vector<2x4x1xf32>
    %cst_2 = arith.constant dense<0.000000e+00> : vector<4x1xf32>
    %3 = vector.multi_reduction <add>, %2, %cst_2 [0] : vector<2x4x1xf32> to vector<4x1xf32>
    %4 = vector.shape_cast %3 : vector<4x1xf32> to vector<1x4x1xf32>
    %cst_3 = arith.constant 0.001953125 : f32
    %5 = vector.broadcast %cst_3 : f32 to vector<1x4x1xf32>
    %6 = arith.mulf %4, %5 : vector<1x4x1xf32>
    %7 = vector.broadcast %6 : vector<1x4x1xf32> to vector<2x4x256xf32>
    %8 = arith.subf %0, %7 : vector<2x4x256xf32>
    %9 = arith.mulf %8, %8 : vector<2x4x256xf32>
    %cst_4 = arith.constant dense<0.000000e+00> : vector<2x4xf32>
    %10 = vector.multi_reduction <add>, %9, %cst_4 [2] : vector<2x4x256xf32> to vector<2x4xf32>
    %11 = vector.shape_cast %10 : vector<2x4xf32> to vector<2x4x1xf32>
    %cst_5 = arith.constant dense<0.000000e+00> : vector<4x1xf32>
    %12 = vector.multi_reduction <add>, %11, %cst_5 [0] : vector<2x4x1xf32> to vector<4x1xf32>
    %13 = vector.shape_cast %12 : vector<4x1xf32> to vector<1x4x1xf32>
    %cst_6 = arith.constant 0.001953125 : f32
    %14 = vector.broadcast %cst_6 : f32 to vector<1x4x1xf32>
    %15 = arith.mulf %13, %14 : vector<1x4x1xf32>
    %cst_7 = arith.constant 9.99999974E-6 : f32
    %16 = vector.broadcast %cst_7 : f32 to vector<1x4x1xf32>
    %17 = arith.addf %15, %16 : vector<1x4x1xf32>
    %18 = math.rsqrt %17 : vector<1x4x1xf32>
    %c0_8 = arith.constant 0 : index
    %c0_9 = arith.constant 0 : index
    %19 = vector.load %arg2[%c0_8, %c0_9] : memref<4x1xf32, #tpu.memory_space<vmem>>, vector<4x1xf32>
    %20 = vector.shape_cast %19 : vector<4x1xf32> to vector<1x4x1xf32>
    %21 = arith.mulf %18, %20 : vector<1x4x1xf32>
    %c0_10 = arith.constant 0 : index
    %c0_11 = arith.constant 0 : index
    %22 = vector.load %arg3[%c0_10, %c0_11] : memref<4x1xf32, #tpu.memory_space<vmem>>, vector<4x1xf32>
    %23 = vector.shape_cast %22 : vector<4x1xf32> to vector<1x4x1xf32>
    %24 = vector.broadcast %21 : vector<1x4x1xf32> to vector<2x4x256xf32>
    %25 = arith.mulf %8, %24 : vector<2x4x256xf32>
    %26 = vector.broadcast %23 : vector<1x4x1xf32> to vector<2x4x256xf32>
    %27 = arith.addf %25, %26 : vector<2x4x256xf32>
    %cst_12 = arith.constant 0.000000e+00 : f32
    %28 = vector.broadcast %cst_12 : f32 to vector<2x4x256xf32>
    %29 = arith.maximumf %27, %28 : vector<2x4x256xf32>
    %c0_13 = arith.constant 0 : index
    %c0_14 = arith.constant 0 : index
    %c0_15 = arith.constant 0 : index
    %30 = vector.load %arg4[%c0_13, %c0_14, %c0_15] : memref<2x4x256xf32, #tpu.memory_space<vmem>>, vector<2x4x256xf32>
    tpu.vector_store %arg4[%c0_13, %c0_14, %c0_15], %29 {strides = array<i32>} : memref<2x4x256xf32, #tpu.memory_space<vmem>>, vector<2x4x256xf32>,
    return
  }
  func.func @transform_0(%arg0: i32) -> (i32, i32, i32) {
    %c0_i32 = arith.constant 0 : i32
    %c0_i32_0 = arith.constant 0 : i32
    %c0_i32_1 = arith.constant 0 : i32
    return %c0_i32, %arg0, %c0_i32_0 : i32, i32, i32
  }
  func.func @transform_1(%arg0: i32) -> (i32, i32) {
    %c0_i32 = arith.constant 0 : i32
    %c0_i32_0 = arith.constant 0 : i32
    return %arg0, %c0_i32 : i32, i32
  }
  func.func @transform_2(%arg0: i32) -> (i32, i32) {
    %c0_i32 = arith.constant 0 : i32
    %c0_i32_0 = arith.constant 0 : i32
    return %arg0, %c0_i32 : i32, i32
  }
  func.func @transform_3(%arg0: i32) -> (i32, i32, i32) {
    %c0_i32 = arith.constant 0 : i32
    %c0_i32_0 = arith.constant 0 : i32
    %c0_i32_1 = arith.constant 0 : i32
    return %c0_i32, %arg0, %c0_i32_0 : i32, i32, i32
  }
}

</mosaic_0001>

<bundles_post_ra>
// kernel: tpu_custom_call.1
= control target key start
LH: loop header
LB: loop body
LE: loop exit
PB: predicated region body
PF: predicated region fallthrough
CT: control target
= control target key end

     0   :  { %8 = vsyncpa [#allocation3], 0  ;;  %s273_s0 = inlined_call_operand.hbm [shape: f32[2,4,256], index: 0, kind: input, shape index: {}]   ;;  %s274_s1 = inlined_call_operand.vmem [shape: f32[4,1], index: 1, kind: input, shape index: {}]   ;;  %s275_s2 = inlined_call_operand.vmem [shape: f32[4,1], index: 2, kind: input, shape index: {}]   ;;  %s276_s3 = inlined_call_operand.hbm [shape: f32[2,4,256], index: 3, kind: output, shape index: {}]  }
   0x1   :  { %9 = vsyncpa [#allocation4], 0  ;;  %s199_s12 = smov [#allocation2]   ;;  %s151_s16 = scalar_lea.hbm %s273_s0, 256 }
   0x2   :  { %s15_s13 = sshll.u32 %s199_s12, 4  ;;  %p152_p0 = scmp.ne.s32.totalorder %s273_s0, %s151_s16  ;;  %s16_s13 = int_to_ptr.vmem [resolvable:$true] %s15_s13 }
   0x3   :  { %p155_p1 = scmp.lt.u32.totalorder %s151_s16, %s273_s0 }
   0x5   :  { %p157_p2 = pnand %p155_p1, %p152_p0 }
   0x7   :  { %160 = shalt.err (!%p157_p2)
}
   0x8   :  { %s161_s21 = scalar_lea.vmem %s16_s13, 256  ;;  %p166_p4 = scmp.lt.s32.totalorder %s16_s13, %s16_s13 }
   0x9   :  { %p162_p3 = scmp.ne.s32.totalorder %s16_s13, %s161_s21  ;;  %p167_p5 = scmp.lt.s32.totalorder %s161_s21, %s161_s21 }
   0xb   :  { %p168_p6 = por %p167_p5, %p166_p4 }
   0xd   :  { %p169_p7 = pnand %p168_p6, %p162_p3 }
   0xf   :  { %172 = shalt.err (!%p169_p7)
}
  0x10   :  { %s200_s22 = smov 128   ;;  %s201_s23 = smov 8  }
  0x11   :  { %21 = dma.hbm_to_vmem [thread:$0]  %s273_s0, 256, %s16_s13, [#allocation3], %s200_s22, %s200_s22, %s201_s23  }
  0x12   :  { %195 = dma.done.wait [#allocation3], 256  }
  0x13   :  { %196 = vsyncadd [#allocation3], 4294967040  ;;  %vm37_vm0 = vcmask 1043456   ;;  %v29_v0 = vld [vmem:[#allocation2] sm:$0xff]  ;;  %v30_v1 = vld [vmem:[#allocation2 + $0x8] sm:$0xff]  ;;  %v56_v12 = vlaneseq  ;;  %v203_v35 = vmov 0  }
  0x14   :  { %v33_v2 = vcombine.high %v29_v0, %v29_v0  ;;  %v38_v3 = vsel %vm37_vm0, %v29_v0, 0.0  ;;  %v34_v4 = vcombine.high %v30_v1, %v30_v1  ;;  %v43_v6 = vsel %vm37_vm0, %v30_v1, 0.0  ;;  %145 = vset.pattern.permute.xlu0 %v203_v35  ;;  %146 = vset.pattern.permute.xlu1 %v203_v35  ;;  %v89_v36 = vld [vmem:[%s275_s2] sm:$0xf]  ;;  %s204_s2 = smov [#allocation5]  }
  0x15   :  { %v202_v10 = vmov 839922192   ;;  %v57_v15 = vshrl.u32 %v56_v12, 7  ;;  %v87_v44 = vld [vmem:[%s274_s1] sm:$0xf]  ;;  %s127_s29 = sshll.u32 %s204_s2, 4  ;;  %s128_s29 = int_to_ptr.vmem [resolvable:$true] %s127_s29 }
  0x16   :  { %v39_v5 = vsel %vm37_vm0, %v33_v2, 0.0  ;;  %v44_v7 = vsel %vm37_vm0, %v34_v4, 0.0  ;;  %v54_v11 = vunpack.c.l.s4 %v202_v10  ;;  %s173_s30 = scalar_lea.vmem %s128_s29, 256  ;;  %p178_p9 = scmp.lt.s32.totalorder %s128_s29, %s128_s29 }
  0x17   :  { %v40_v8 = vadd.f32 %v39_v5, %v38_v3  ;;  %v45_v9 = vadd.f32 %v44_v7, %v43_v6  ;;  %p174_p8 = scmp.ne.s32.totalorder %s128_s29, %s173_s30  ;;  %p179_p10 = scmp.lt.s32.totalorder %s173_s30, %s173_s30 }
  0x18   :  { %v55_v14 = vunpack.c.0.s8 %v54_v11 }
  0x19   :  { %41 = vadd.xlane.f32.xlu0 %v40_v8  ;;  %p180_p11 = por %p179_p10, %p178_p9 }
  0x1a   :  { %v58_v19 = vsub.s32 %v55_v14, %v57_v15 }
  0x1b   :  { %p181_p12 = pnand %p180_p11, %p174_p8 }
  0x1d   :  { %46 = vadd.xlane.f32.xlu0 %v45_v9 }
  0xa6   :  { %v42_v13 = vpop.xlane.xlu0 %41 }
  0xa7   :  { %v48_v17 = vsel %vm37_vm0, %v42_v13, 0.0 }
  0xaa   :  { %v47_v16 = vpop.xlane.xlu0 %46 }
  0xab   :  { %v49_v18 = vsel %vm37_vm0, %v47_v16, 0.0 }
  0xac   :  { %v50_v20 = vadd.f32 %v49_v18, %v48_v17 }
  0xae   :  { %v51_v21 = vmul.f32 0.001953125, %v50_v20 }
  0xb0   :  { %v59_v22 = vrot.slane %v51_v21, %v58_v19 }
  0xb2   :  { %v62_v23 = vsub.f32 %v30_v1, %v59_v22  ;;  %v61_v24 = vsub.f32 %v29_v0, %v59_v22 }
  0xb4   :  { %v63_v25 = vmul.f32 %v61_v24, %v61_v24  ;;  %v64_v26 = vmul.f32 %v62_v23, %v62_v23 }
  0xb6   :  { %v67_v27 = vcombine.high %v63_v25, %v63_v25  ;;  %v68_v28 = vcombine.high %v64_v26, %v64_v26  ;;  %v71_v29 = vsel %vm37_vm0, %v63_v25, 0.0  ;;  %v76_v33 = vsel %vm37_vm0, %v64_v26, 0.0 }
  0xb8   :  { %v72_v30 = vsel %vm37_vm0, %v67_v27, 0.0  ;;  %v77_v32 = vsel %vm37_vm0, %v68_v28, 0.0 }
  0xb9   :  { %v73_v31 = vadd.f32 %v72_v30, %v71_v29  ;;  %v78_v34 = vadd.f32 %v77_v32, %v76_v33 }
  0xbb   :  { %74 = vadd.xlane.f32.xlu1 %v73_v31 }
  0xbf   :  { %79 = vadd.xlane.f32.xlu1 %v78_v34 }
  0xd0   :  { %106 = vperm.xlu1 %146, %v89_v36  }
 0x148   :  { %v75_v37 = vpop.xlane.xlu1 %74 }
 0x149   :  { %v81_v39 = vsel %vm37_vm0, %v75_v37, 0.0 }
 0x14c   :  { %v80_v38 = vpop.xlane.xlu1 %79 }
 0x14d   :  { %v82_v40 = vsel %vm37_vm0, %v80_v38, 0.0 }
 0x14e   :  { %v83_v41 = vadd.f32 %v82_v40, %v81_v39 }
 0x150   :  { %v84_v42 = vmul.f32 0.001953125, %v83_v41  ;;  %v107_v47 = vpop.permute.xlu1 %106 }
 0x151   :  { %v114_v50 = vrot.slane %v107_v47, %v58_v19 }
 0x152   :  { %v85_v43 = vadd.f32 1e-05, %v84_v42 }
 0x154   :  { %149 = vrsqrt.f32 %v85_v43 }
 0x15e   :  { %v150_v45 = vpop.eup %149 }
 0x15f   :  { %v88_v46 = vmul.f32 %v150_v45, %v87_v44 }
 0x161   :  { %92 = vperm.xlu0 %145, %v88_v46  }
 0x1e0   :  { %v93_v48 = vpop.permute.xlu0 %92 }
 0x1e1   :  { %v100_v49 = vrot.slane %v93_v48, %v58_v19 }
 0x1e3   :  { %v102_v51 = vmul.f32 %v100_v49, %v61_v24  ;;  %v103_v52 = vmul.f32 %v100_v49, %v62_v23 }
 0x1e5   :  { %v116_v53 = vadd.f32 %v114_v50, %v102_v51  ;;  %v117_v54 = vadd.f32 %v114_v50, %v103_v52 }
 0x1e7   :  { %v118_v55 = vmax.f32 %v116_v53, 0.0  ;;  %v119_v56 = vmax.f32 %v117_v54, 0.0 }
 0x1e9   :  { %120 = vst [vmem:[#allocation5] sm:$0xff] %v118_v55  ;;  %121 = vst [vmem:[#allocation5 + $0x8] sm:$0xff] %v119_v56 }
 0x1ea   :  { %184 = shalt.err (!%p181_p12)
}
 0x1eb   :  { %s185_s5 = scalar_lea.hbm %s276_s3, 256 }
 0x1ec   :  { %p186_p13 = scmp.ne.s32.totalorder %s276_s3, %s185_s5  ;;  %p189_p0 = scmp.lt.u32.totalorder %s185_s5, %s276_s3 }
 0x1ee   :  { %p191_p1 = pnand %p189_p0, %p186_p13 }
 0x1f0   :  { %194 = shalt.err (!%p191_p1)
}
 0x1f1   :  { %133 = dma.vmem_to_hbm [thread:$0]  %s128_s29, 256, %s276_s3, [#allocation4], %s200_s22, %s200_s22, %s201_s23  }
 0x1f2   :  { %197 = dma.done.wait [#allocation4], 256  }
 0x1f3   :  { %198 = vsyncadd [#allocation4], 4294967040 }
 0x1f4   :  { %137 = vsyncpa [#allocation3], 1 }
 0x1f5   :  { %138 = vsyncpa [#allocation4], 1 }

</bundles_post_ra>
